<compile_context>
chip_gen: v6e
topology: v6e:2x2x1
jax: 0.10.0
libtpu: 0.0.40
codegen_flags: <defaults>
</compile_context>

<pallas_src>
import functools

import jax
import jax.numpy as jnp
from jax.experimental import pallas as pl
from jax.experimental.pallas import tpu as pltpu

_LN2 = 0.6931471805599453
_LANE = 128


def _round_up(x, m):
    return (x + m - 1) // m * m


def _jsd_kernel(s_ref, t_ref, o_ref, *, num_pixels):
    # s_ref, t_ref: (C, ST, 128) logit tiles (channels on the leading, non-vreg axis).
    # o_ref: (1, 8, 128) per-block partial sum of KL(P_T||M) + KL(P_S||M) over this tile.
    C, ST, L = s_ref.shape
    j = pl.program_id(1)

    x_s = s_ref[...].astype(jnp.float32)
    x_t = t_ref[...].astype(jnp.float32)

    def softmax_parts(x):
        m = jnp.max(x, axis=0, keepdims=True)            # (1, ST, 128) - VPU max over C
        e = jnp.exp(x - m)                               # 1 exp per element
        den = jnp.sum(e, axis=0, keepdims=True)          # (1, ST, 128) - VPU adds over C
        p = e * pl.reciprocal(den)                       # softmax probabilities
        log_p = (x - m) - jnp.log(den)                   # log-softmax (1 log per pixel)
        return p, log_p

    p_s, log_p_s = softmax_parts(x_s)
    p_t, log_p_t = softmax_parts(x_t)

    # log M = log((P_s + P_t) / 2)   (1 log per element)
    log_m = jnp.log(p_s + p_t) - jnp.float32(_LN2)

    # element-wise KL(P_T||M) + KL(P_S||M) summands (log-space: no 0*log(0) NaN path)
    kl = p_t * (log_p_t - log_m) + p_s * (log_p_s - log_m)

    # reduce over channels (leading dim -> pure VPU elementwise adds)
    per_pixel = jnp.sum(kl, axis=0)                      # (ST, 128)

    # mask padded pixels (pixel index >= num_pixels) to exactly zero
    row_ids = jax.lax.broadcasted_iota(jnp.int32, (ST, L), 0)
    lane_ids = jax.lax.broadcasted_iota(jnp.int32, (ST, L), 1)
    pix = (j * ST + row_ids) * L + lane_ids
    per_pixel = jnp.where(pix < num_pixels, per_pixel, jnp.float32(0.0))

    # fold sublane-row groups into a lane-dense (8, 128) partial (vreg-wise adds)
    o_ref[0] = per_pixel.reshape(ST // 8, 8, L).sum(axis=0)


def _choose_tile(C, rows, itemsize, budget_bytes):
    """Pick ST (sublane rows of 128 pixels per tile) so pipelined blocks fit VMEM."""
    rows8 = _round_up(max(rows, 1), 8)
    per_row_bytes = 4 * C * _LANE * itemsize             # 2 inputs x 2 pipeline buffers
    st_max = max(8, (budget_bytes // per_row_bytes) // 8 * 8)
    st_max = min(st_max, rows8)
    num_tiles = -(-rows8 // st_max)
    st = _round_up(-(-rows8 // num_tiles), 8)
    return st, num_tiles


def jsd_pixelwise(preds_S, preds_T, *, vmem_budget_bytes=24 * 1024 * 1024):
    """Pallas implementation of CriterionJSDPixelWise.forward (inputs NCHW)."""
    N, C, W, H = preds_S.shape
    P = W * H

    rows = -(-P // _LANE)
    itemsize = max(jnp.dtype(preds_S.dtype).itemsize, jnp.dtype(preds_T.dtype).itemsize)
    ST, T = _choose_tile(C, rows, itemsize, vmem_budget_bytes)
    rows_pad = T * ST
    P_pad = rows_pad * _LANE

    def to_tiles(x):
        # NCHW -> (N, C, P) -> zero-pad pixels -> (N, C, rows_pad, 128).
        # Padded pixels are masked to zero inside the kernel. Native dtype is kept;
        # the kernel casts to f32 after the DMA (halves HBM traffic for bf16 inputs).
        x = x.reshape(N, C, P)
        if P_pad != P:
            x = jnp.pad(x, ((0, 0), (0, 0), (0, P_pad - P)))
        return x.reshape(N, C, rows_pad, _LANE)

    s = to_tiles(preds_S)
    t = to_tiles(preds_T)

    kernel = functools.partial(_jsd_kernel, num_pixels=P)

    partials = pl.pallas_call(
        kernel,
        out_shape=jax.ShapeDtypeStruct((N, T, 8, _LANE), jnp.float32),
        grid_spec=pltpu.PrefetchScalarGridSpec(
            num_scalar_prefetch=0,
            grid=(N, T),
            in_specs=[
                pl.BlockSpec((None, C, ST, _LANE), lambda i, j: (i, 0, j, 0)),
                pl.BlockSpec((None, C, ST, _LANE), lambda i, j: (i, 0, j, 0)),
            ],
            out_specs=pl.BlockSpec((None, 1, 8, _LANE), lambda i, j: (i, j, 0, 0)),
        ),
        compiler_params=pltpu.CompilerParams(
            dimension_semantics=("parallel", "parallel"),
            vmem_limit_bytes=48 * 1024 * 1024,
        ),
    )(s, t)

    # KLDivLoss('batchmean') divides each KL by num_pixels; module divides by 2 and by N.
    return jnp.sum(partials) / jnp.float32(2 * P * N)


def _jsd_reference(preds_S, preds_T):
    # Pure-JAX reference mirroring the PyTorch module (for correctness checking only).
    N, C, W, H = preds_S.shape
    P = W * H
    s = jnp.transpose(preds_S, (0, 2, 3, 1)).reshape(N, P, C).astype(jnp.float32)
    t = jnp.transpose(preds_T, (0, 2, 3, 1)).reshape(N, P, C).astype(jnp.float32)
    ps = jax.nn.softmax(s, axis=-1)
    pt = jax.nn.softmax(t, axis=-1)
    log_m = jnp.log((ps + pt) * 0.5)
    kl = pt * (jnp.log(pt) - log_m) + ps * (jnp.log(ps) - log_m)
    per_sample = jnp.sum(kl, axis=(1, 2)) / (2.0 * P)
    return jnp.mean(per_sample)


if __name__ == "__main__":
    key = jax.random.PRNGKey(0)
    k1, k2 = jax.random.split(key)
    N, C, W, H = 2, 4, 16, 16
    preds_S = jax.random.normal(k1, (N, C, W, H), dtype=jnp.float32)
    preds_T = jax.random.normal(k2, (N, C, W, H), dtype=jnp.float32)

    out = jax.block_until_ready(jsd_pixelwise(preds_S, preds_T))
    ref = jax.block_until_ready(_jsd_reference(preds_S, preds_T))
    assert jnp.allclose(out, ref, rtol=1e-5, atol=1e-6), (out, ref)

    print("KERNEL_OK")
</pallas_src>

<mosaic_0001>
module attributes {stable_mosaic.version = 11 : i64} {
  func.func @_jsd_kernel(%arg0: i32, %arg1: i32, %arg2: memref<1x4x8x128xf32, #tpu.memory_space<vmem>>, %arg3: memref<1x4x8x128xf32, #tpu.memory_space<vmem>>, %arg4: memref<1x1x8x128xf32, #tpu.memory_space<vmem>>) attributes {dimension_semantics = [#tpu.dimension_semantics<parallel>, #tpu.dimension_semantics<parallel>], iteration_bounds = array<i64: 2, 1>, scalar_prefetch = 0 : i64, scratch_operands = 0 : i64, tpu.core_type = #tpu.core_type<tc>, window_params = [{transform_indices = @transform_0, window_bounds = array<i64: 1, 4, 8, 128>}, {transform_indices = @transform_1, window_bounds = array<i64: 1, 4, 8, 128>}, {transform_indices = @transform_2, window_bounds = array<i64: 1, 1, 8, 128>}]} {
    %c0 = arith.constant 0 : index
    %c0_0 = arith.constant 0 : index
    %c0_1 = arith.constant 0 : index
    %c0_2 = arith.constant 0 : index
    %0 = vector.load %arg2[%c0, %c0_0, %c0_1, %c0_2] : memref<1x4x8x128xf32, #tpu.memory_space<vmem>>, vector<1x4x8x128xf32>
    %1 = vector.shape_cast %0 : vector<1x4x8x128xf32> to vector<4x8x128xf32>
    %c0_3 = arith.constant 0 : index
    %c0_4 = arith.constant 0 : index
    %c0_5 = arith.constant 0 : index
    %c0_6 = arith.constant 0 : index
    %2 = vector.load %arg3[%c0_3, %c0_4, %c0_5, %c0_6] : memref<1x4x8x128xf32, #tpu.memory_space<vmem>>, vector<1x4x8x128xf32>
    %3 = vector.shape_cast %2 : vector<1x4x8x128xf32> to vector<4x8x128xf32>
    %cst = arith.constant dense<0xFF800000> : vector<8x128xf32>
    %4 = vector.multi_reduction <maximumf>, %1, %cst [0] : vector<4x8x128xf32> to vector<8x128xf32>
    %5 = vector.shape_cast %4 : vector<8x128xf32> to vector<1x8x128xf32>
    %6 = vector.broadcast %5 : vector<1x8x128xf32> to vector<4x8x128xf32>
    %7 = arith.subf %1, %6 : vector<4x8x128xf32>
    %8 = math.exp %7 : vector<4x8x128xf32>
    %cst_7 = arith.constant dense<0.000000e+00> : vector<8x128xf32>
    %9 = vector.multi_reduction <add>, %8, %cst_7 [0] : vector<4x8x128xf32> to vector<8x128xf32>
    %10 = vector.shape_cast %9 : vector<8x128xf32> to vector<1x8x128xf32>
    %11 = tpu.reciprocal %10 : vector<1x8x128xf32> -> vector<1x8x128xf32>
    %12 = vector.broadcast %11 : vector<1x8x128xf32> to vector<4x8x128xf32>
    %13 = arith.mulf %8, %12 : vector<4x8x128xf32>
    %14 = vector.broadcast %5 : vector<1x8x128xf32> to vector<4x8x128xf32>
    %15 = arith.subf %1, %14 : vector<4x8x128xf32>
    %16 = math.log %10 : vector<1x8x128xf32>
    %17 = vector.broadcast %16 : vector<1x8x128xf32> to vector<4x8x128xf32>
    %18 = arith.subf %15, %17 : vector<4x8x128xf32>
    %cst_8 = arith.constant dense<0xFF800000> : vector<8x128xf32>
    %19 = vector.multi_reduction <maximumf>, %3, %cst_8 [0] : vector<4x8x128xf32> to vector<8x128xf32>
    %20 = vector.shape_cast %19 : vector<8x128xf32> to vector<1x8x128xf32>
    %21 = vector.broadcast %20 : vector<1x8x128xf32> to vector<4x8x128xf32>
    %22 = arith.subf %3, %21 : vector<4x8x128xf32>
    %23 = math.exp %22 : vector<4x8x128xf32>
    %cst_9 = arith.constant dense<0.000000e+00> : vector<8x128xf32>
    %24 = vector.multi_reduction <add>, %23, %cst_9 [0] : vector<4x8x128xf32> to vector<8x128xf32>
    %25 = vector.shape_cast %24 : vector<8x128xf32> to vector<1x8x128xf32>
    %26 = tpu.reciprocal %25 : vector<1x8x128xf32> -> vector<1x8x128xf32>
    %27 = vector.broadcast %26 : vector<1x8x128xf32> to vector<4x8x128xf32>
    %28 = arith.mulf %23, %27 : vector<4x8x128xf32>
    %29 = vector.broadcast %20 : vector<1x8x128xf32> to vector<4x8x128xf32>
    %30 = arith.subf %3, %29 : vector<4x8x128xf32>
    %31 = math.log %25 : vector<1x8x128xf32>
    %32 = vector.broadcast %31 : vector<1x8x128xf32> to vector<4x8x128xf32>
    %33 = arith.subf %30, %32 : vector<4x8x128xf32>
    %34 = arith.addf %13, %28 : vector<4x8x128xf32>
    %35 = math.log %34 : vector<4x8x128xf32>
    %cst_10 = arith.constant 0.693147182 : f32
    %36 = vector.broadcast %cst_10 : f32 to vector<4x8x128xf32>
    %37 = arith.subf %35, %36 : vector<4x8x128xf32>
    %38 = arith.subf %33, %37 : vector<4x8x128xf32>
    %39 = arith.mulf %28, %38 : vector<4x8x128xf32>
    %40 = arith.subf %18, %37 : vector<4x8x128xf32>
    %41 = arith.mulf %13, %40 : vector<4x8x128xf32>
    %42 = arith.addf %39, %41 : vector<4x8x128xf32>
    %cst_11 = arith.constant dense<0.000000e+00> : vector<8x128xf32>
    %43 = vector.multi_reduction <add>, %42, %cst_11 [0] : vector<4x8x128xf32> to vector<8x128xf32>
    %44 = tpu.iota {dimensions = array<i32: 0>} : vector<8x128xi32>
    %45 = tpu.iota {dimensions = array<i32: 1>} : vector<8x128xi32>
    %c8_i32 = arith.constant 8 : i32
    %46 = arith.muli %arg1, %c8_i32 : i32
    %47 = vector.broadcast %46 : i32 to vector<8x128xi32>
    %48 = arith.addi %47, %44 : vector<8x128xi32>
    %c128_i32 = arith.constant 128 : i32
    %49 = vector.broadcast %c128_i32 : i32 to vector<8x128xi32>
    %50 = arith.muli %48, %49 : vector<8x128xi32>
    %51 = arith.addi %50, %45 : vector<8x128xi32>
    %c256_i32 = arith.constant 256 : i32
    %52 = vector.broadcast %c256_i32 : i32 to vector<8x128xi32>
    %53 = arith.cmpi slt, %51, %52 : vector<8x128xi32>
    %cst_12 = arith.constant 0.000000e+00 : f32
    %54 = vector.broadcast %cst_12 : f32 to vector<8x128xf32>
    %55 = arith.select %53, %43, %54 : vector<8x128xi1>, vector<8x128xf32>
    %56 = vector.shape_cast %55 : vector<8x128xf32> to vector<1x8x128xf32>
    %cst_13 = arith.constant dense<0.000000e+00> : vector<8x128xf32>
    %57 = vector.multi_reduction <add>, %56, %cst_13 [0] : vector<1x8x128xf32> to vector<8x128xf32>
    %c0_14 = arith.constant 0 : index
    %c0_15 = arith.constant 0 : index
    %c0_16 = arith.constant 0 : index
    %c0_17 = arith.constant 0 : index
    %58 = vector.load %arg4[%c0_14, %c0_15, %c0_16, %c0_17] : memref<1x1x8x128xf32, #tpu.memory_space<vmem>>, vector<1x1x8x128xf32>
    %59 = vector.shape_cast %58 : vector<1x1x8x128xf32> to vector<8x128xf32>
    %60 = vector.shape_cast %57 : vector<8x128xf32> to vector<1x1x8x128xf32>
    tpu.vector_store %arg4[%c0_14, %c0_15, %c0_16, %c0_17], %60 {strides = array<i32>} : memref<1x1x8x128xf32, #tpu.memory_space<vmem>>, vector<1x1x8x128xf32>,
    return
  }
  func.func @transform_0(%arg0: i32, %arg1: i32) -> (i32, i32, i32, i32) {
    %c0_i32 = arith.constant 0 : i32
    %c0_i32_0 = arith.constant 0 : i32
    %c0_i32_1 = arith.constant 0 : i32
    return %arg0, %c0_i32, %arg1, %c0_i32_0 : i32, i32, i32, i32
  }
  func.func @transform_1(%arg0: i32, %arg1: i32) -> (i32, i32, i32, i32) {
    %c0_i32 = arith.constant 0 : i32
    %c0_i32_0 = arith.constant 0 : i32
    %c0_i32_1 = arith.constant 0 : i32
    return %arg0, %c0_i32, %arg1, %c0_i32_0 : i32, i32, i32, i32
  }
  func.func @transform_2(%arg0: i32, %arg1: i32) -> (i32, i32, i32, i32) {
    %c0_i32 = arith.constant 0 : i32
    %c0_i32_0 = arith.constant 0 : i32
    %c0_i32_1 = arith.constant 0 : i32
    return %arg0, %arg1, %c0_i32, %c0_i32_0 : i32, i32, i32, i32
  }
}

</mosaic_0001>

<bundles_post_ra>
// kernel: tpu_custom_call.1
= control target key start
LH: loop header
LB: loop body
LE: loop exit
PB: predicated region body
PF: predicated region fallthrough
CT: control target
= control target key end

     0   :  { %7 = vsyncpa [#allocation3], 0  ;;  %s954_s0 = inlined_call_operand.hbm [shape: f32[2,4,8,128], index: 0, kind: input, shape index: {}]   ;;  %s955_s1 = inlined_call_operand.hbm [shape: f32[2,4,8,128], index: 1, kind: input, shape index: {}]   ;;  %s956_s2 = inlined_call_operand.hbm [shape: f32[2,1,8,128], index: 2, kind: output, shape index: {}]  }
   0x1   :  { %9 = vsyncpa [#allocation3 + $0x1], 0 }
   0x2   :  { %10 = vsyncpa [#allocation6], 0 }
   0x3   :  { %12 = vsyncpa [#allocation6 + $0x1], 0 }
   0x4   :  { %13 = vsyncpa [#allocation4], 0 }
   0x5   :  { %15 = vsyncpa [#allocation4 + $0x1], 0  ;;  %s748_s9 = smov 0   ;;  %s750_s10 = smov 0  }
   0x6   :  { %s752_s11 = smov 0   ;;  %s754_s12 = smov 0  }
   0x7   :  { %s756_s13 = smov 0   ;;  %s758_s14 = smov 0  }
   0x8 LB: > { %s461_s15 = sadd.s32 4294967295, %s726_s14   ;;  %s462_s16 = sadd.s32 4294967294, %s726_s14   ;;  %s726_s14 = sphi %s758_s14, %s21_s14   ;;  %s722_s13 = sphi %s756_s13, %s968_s13   ;;  %s718_s12 = sphi %s754_s12, %s967_s12   ;;  %s714_s11 = sphi %s752_s11, %s966_s11   ;;  %s710_s10 = sphi %s750_s10, %s965_s10   ;;  %s706_s9 = sphi %s748_s9, %s964_s9  }
   0x9   : > { %s33_s17 = sadd.s32 1, %s722_s13  ;;  %s42_s18 = sadd.s32 1, %s714_s11 }
   0xa   : > { %p35_p0 = scmp.ge.s32.totalorder %s33_s17, 2  ;;  %p49_p1 = scmp.ne.s32.totalorder %s714_s11, %s710_s10 }
   0xb   : > { %p50_p2 = scmp.eq.s32.totalorder %s726_s14, 0  ;;  %p55_p3 = scmp.ne.s32.totalorder %s710_s10, %s706_s9 }
   0xc   : > { %s970_s17 = smov (%p35_p0, %s33_s17), 0  ;;  %p56_p5 = scmp.eq.s32.totalorder %s461_s15, 0 }
   0xd   : > { %p789_p4 = por %p50_p2, %p49_p1  ;;  %s37_s20 = ssub.s32 %s722_s13, %s970_s17 }
   0xe   : > { %p109_p6 = scmp.eq.s32.totalorder %s461_s15, 1  ;;  %p40_p7 = scmp.eq.s32.totalorder %s37_s20, 0 }
   0xf   : > { %p795_p8 = por %p56_p5, %p55_p3  ;;  %p115_p10 = scmp.eq.s32.totalorder %s462_s16, 1 }
  0x10   : > { %p799_p9 = por %p109_p6, %p49_p1  ;;  %p502_p13 = scmp.lt.s32.totalorder %s726_s14, 2 }
  0x11   : > { %s804_s23 = scalar_select %p40_p7, %s714_s11, %s42_s18  }
  0x12   : > { %p806_p11 = por %p115_p10, %p55_p3  ;;  %s813_s25 = sand.u32 1, %s714_s11  }
  0x13   : > { %s465_s26 = sshll.u32 %s813_s25, 5  ;;  %s483_s27 = sshll.u32 %s722_s13, 9 }
  0x14   : > { %s146_s30 = scalar_lea.hbm %s954_s0, %s483_s27  ;;  %s139_s3 = scalar_lea.vmem [#allocation2], %s465_s26 }
  0x15   : > { %s147_s4 = sshll.u32 %s139_s3, 4  ;;  %p826_p0 = pnand %p502_p13, %p789_p4  ;;  %s148_s4 = int_to_ptr.vmem [resolvable:$true] %s147_s4 }
  0x16   : > { %p471_p1 = scmp.ge.s32.totalorder %s726_s14, 1  ;;  %s136_s6 = scalar_lea.sflag [#allocation3], %s813_s25 }
  0x17   : > { %p588_p2 = pneg %p826_p0  ;;  %s599_s7 = scalar_lea.vmem %s148_s4, 512 }
  0x18   : > { %p600_p3 = scmp.ne.s32.totalorder %s148_s4, %s599_s7  ;;  %s728_s8 = smov [#allocation2]  }
  0x19   : > { %s604_s15 = sshll.u32 %s728_s8, 4  ;;  %s605_s15 = int_to_ptr.vmem [resolvable:$false] %s604_s15 }
  0x1a   : > { %p602_p5 = pnand %p600_p3, %p588_p2  ;;  %s606_s16 = scalar_lea.vmem %s605_s15, 1024 }
  0x1b   : > { %p607_p4 = scmp.lt.s32.totalorder %s148_s4, %s605_s15  ;;  %p608_p7 = scmp.lt.s32.totalorder %s606_s16, %s599_s7 }
  0x1c   : > { %p603_p6 = pneg %p602_p5 }
  0x1d   : > { %p609_p10 = por %p608_p7, %p607_p4 }
  0x1f   : > { %p610_p13 = pnand %p609_p10, %p603_p6 }
  0x21   : > { %613 = shalt.err (!%p610_p13)
}
  0x22   : > { %s729_s18 = smov 128   ;;  %s730_s19 = smov 8  }
  0x23   : > { %494 = dma.hbm_to_vmem [thread:$0]  (!%p826_p0), %s146_s30, 512, %s148_s4, %s136_s6, %s729_s18, %s729_s18, %s730_s19  }
  0x24   : > { %p177_p3 = scmp.lt.s32.totalorder %s726_s14, 3  ;;  %s168_s29 = scalar_lea.hbm %s955_s1, %s483_s27 }
  0x25   : > { %s161_s7 = scalar_lea.vmem [#allocation5], %s465_s26  ;;  %s158_s15 = scalar_lea.sflag [#allocation6], %s813_s25 }
  0x26   : > { %p847_p5 = pnand %p471_p1, %p177_p3  ;;  %s169_s8 = sshll.u32 %s161_s7, 4  ;;  %s170_s8 = int_to_ptr.vmem [resolvable:$true] %s169_s8 }
  0x27   : > { %s627_s16 = scalar_lea.vmem %s170_s8, 512  ;;  %s731_s30 = smov [#allocation5]  }
  0x28   : > { %p628_p6 = scmp.ne.s32.totalorder %s170_s8, %s627_s16  ;;  %s632_s4 = sshll.u32 %s731_s30, 4  ;;  %s633_s4 = int_to_ptr.vmem [resolvable:$false] %s632_s4 }
  0x29   : > { %s634_s27 = scalar_lea.vmem %s633_s4, 1024  ;;  %p635_p10 = scmp.lt.s32.totalorder %s170_s8, %s633_s4 }
  0x2a   : > { %p630_p4 = pnand %p628_p6, %p588_p2  ;;  %p636_p1 = scmp.lt.s32.totalorder %s634_s27, %s627_s16 }
  0x2c   : > { %p631_p7 = pneg %p630_p4  ;;  %p637_p13 = por %p636_p1, %p635_p10 }
  0x2e   : > { %p638_p3 = pnand %p637_p13, %p631_p7 }
  0x30   : > { %641 = shalt.err (!%p638_p3)
}
  0x31   : > { %497 = dma.hbm_to_vmem [thread:$0]  (!%p826_p0), %s168_s29, 512, %s170_s8, %s158_s15, %s729_s18, %s729_s18, %s730_s19  }
  0x32   : > { %181 = sbr.rel (%p847_p5) target bundleno = 156 (0x9c), region = 28  ;;  %s862_s25 = sand.u32 (!%p847_p5), 1, %s710_s10  }
  0x33   : > { %s472_s26 = sshll.u32 (!%p847_p5), %s862_s25, 5  ;;  %s184_s6 = scalar_lea.sflag (!%p847_p5), [#allocation3], %s862_s25 }
  0x34   : > { %s187_s20 = scalar_lea.vmem (!%p847_p5), [#allocation2], %s472_s26 }
  0x37   : > { %693 = dma.done.wait (%p795_p8), %s184_s6, 512  }
  0x38   : > { %695 = vsyncadd (%p795_p8), %s184_s6, 4294966784  ;;  %s193_s5 = scalar_lea.sflag [#allocation6], %s862_s25  ;;  %s196_s18 = scalar_lea.vmem [#allocation5], %s472_s26 }
  0x39   : > { %697 = dma.done.wait (%p795_p8), %s193_s5, 512  }
  0x3a   : > { %699 = vsyncadd (%p795_p8), %s193_s5, 4294966784  ;;  %v222_v0 = vld [vmem:[%s187_s20] sm:$0xff]  ;;  %v223_v1 = vld [vmem:[%s187_s20 + $0x8] sm:$0xff]  ;;  %v327_v62 = vlaneseq  ;;  %s474_s21 = sshll.u32 %s862_s25, 3  ;;  %s480_s29 = sshll.u32 %s718_s12, 7 }
  0x3b   : > { %v224_v2 = vld [vmem:[%s187_s20 + $0x10] sm:$0xff]  ;;  %v225_v3 = vld [vmem:[%s187_s20 + $0x18] sm:$0xff]  ;;  %v226_v4 = vld [vmem:[%s196_s18] sm:$0xff]  ;;  %v230_v6 = vmax.f32 %v222_v0, %v223_v1  ;;  %s221_s19 = scalar_lea.vmem [#allocation7], %s474_s21  ;;  %s353_s8 = scalar_lea.hbm %s956_s2, %s480_s29 }
  0x3c   : > { %v227_v5 = vld [vmem:[%s196_s18 + $0x8] sm:$0xff]  ;;  %v228_v7 = vld [vmem:[%s196_s18 + $0x10] sm:$0xff]  ;;  %v229_v8 = vld [vmem:[%s196_s18 + $0x18] sm:$0xff]  ;;  %v231_v9 = vmax.f32 %v224_v2, %v225_v3  ;;  %s355_s28 = sshll.u32 %s221_s19, 4  ;;  %s341_s15 = scalar_lea.sflag [#allocation4], %s862_s25  ;;  %s909_s28 = int_to_ptr.vmem [resolvable:$true] %s355_s28 }
  0x3d   : > { %v259_v10 = vmax.f32 %v226_v4, %v227_v5  ;;  %v260_v11 = vmax.f32 %v228_v7, %v229_v8  ;;  %s642_s16 = scalar_lea.vmem %s909_s28, 128  ;;  %s732_s12 = smov [#allocation7]  }
  0x3e   : > { %v232_v12 = vmax.f32 %v230_v6, %v231_v9  ;;  %p643_p8 = scmp.ne.s32.totalorder %s909_s28, %s642_s16  ;;  %s646_s30 = sshll.u32 %s732_s12, 4  ;;  %s647_s30 = int_to_ptr.vmem [resolvable:$false] %s646_s30 }
  0x3f   : > { %v261_v13 = vmax.f32 %v259_v10, %v260_v11  ;;  %s648_s4 = scalar_lea.vmem %s647_s30, 256  ;;  %p649_p5 = scmp.lt.s32.totalorder %s909_s28, %s647_s30 }
  0x40   : > { %v875_v14 = vsub.f32 %v222_v0, %v232_v12  ;;  %v877_v15 = vsub.f32 %v223_v1, %v232_v12  ;;  %v879_v16 = vsub.f32 %v224_v2, %v232_v12  ;;  %v881_v17 = vsub.f32 %v225_v3, %v232_v12  ;;  %p644_p0 = pnand %p643_p8, %p799_p9  ;;  %p650_p6 = scmp.lt.s32.totalorder %s648_s4, %s642_s16 }
  0x41   : > { %v883_v18 = vsub.f32 %v226_v4, %v261_v13  ;;  %v885_v19 = vsub.f32 %v227_v5, %v261_v13  ;;  %v890_v23 = vsub.f32 %v228_v7, %v261_v13  ;;  %v893_v25 = vsub.f32 %v229_v8, %v261_v13 }
  0x42   : > { %v237_v20 = vmul.f32 1.442695, %v875_v14  ;;  %v239_v21 = vmul.f32 1.442695, %v877_v15  ;;  %v241_v22 = vmul.f32 1.442695, %v879_v16  ;;  %p645_p2 = pneg %p644_p0  ;;  %p651_p4 = por %p650_p6, %p649_p5 }
  0x43   : > { %v243_v24 = vmul.f32 1.442695, %v881_v17  ;;  %v266_v26 = vmul.f32 1.442695, %v883_v18  ;;  %v268_v27 = vmul.f32 1.442695, %v885_v19 }
  0x44   : > { %554 = vpow2.f32 %v237_v20  ;;  %v270_v28 = vmul.f32 1.442695, %v890_v23  ;;  %v272_v29 = vmul.f32 1.442695, %v893_v25  ;;  %v328_v8 = vshrl.u32 %v327_v62, 7  ;;  %p652_p7 = pnand %p651_p4, %p645_p2 }
  0x45   : > { %556 = vpow2.f32 %v239_v21 }
  0x46   : > { %558 = vpow2.f32 %v241_v22 }
  0x47   : > { %560 = vpow2.f32 %v243_v24 }
  0x48   : > { %562 = vpow2.f32 %v266_v26 }
  0x49   : > { %564 = vpow2.f32 %v268_v27 }
  0x4a   : > { %566 = vpow2.f32 %v270_v28 }
  0x4b   : > { %568 = vpow2.f32 %v272_v29  ;;  %v334_v29 = vmul.u32 128, %v328_v8 }
  0x51   : > { %v555_v30 = vpop.eup %554 }
  0x52   : > { %v557_v31 = vpop.eup %556 }
  0x53   : > { %v559_v32 = vpop.eup %558  ;;  %v245_v33 = vadd.f32 %v557_v31, %v555_v30 }
  0x54   : > { %v561_v34 = vpop.eup %560 }
  0x55   : > { %v563_v35 = vpop.eup %562  ;;  %v246_v36 = vadd.f32 %v559_v32, %v245_v33 }
  0x56   : > { %v565_v37 = vpop.eup %564 }
  0x57   : > { %v567_v38 = vpop.eup %566  ;;  %v247_v39 = vadd.f32 %v561_v34, %v246_v36  ;;  %v274_v40 = vadd.f32 %v565_v37, %v563_v35 }
  0x58   : > { %v569_v41 = vpop.eup %568 }
  0x59   : > { %570 = vrcp.f32 %v247_v39  ;;  %v275_v42 = vadd.f32 %v567_v38, %v274_v40 }
  0x5b   : > { %v276_v43 = vadd.f32 %v569_v41, %v275_v42 }
  0x5d   : > { %572 = vrcp.f32 %v276_v43 }
  0x5e   : > { %574 = vlog2.f32 %v247_v39 }
  0x5f   : > { %576 = vlog2.f32 %v276_v43 }
  0x66   : > { %v571_v44 = vpop.eup %570 }
  0x67   : > { %v249_v45 = vmul.f32 %v571_v44, %v555_v30  ;;  %v250_v46 = vmul.f32 %v571_v44, %v557_v31  ;;  %v251_v47 = vmul.f32 %v571_v44, %v559_v32  ;;  %v252_v49 = vmul.f32 %v571_v44, %v561_v34 }
  0x6a   : > { %v573_v48 = vpop.eup %572 }
  0x6b   : > { %v278_v50 = vmul.f32 %v573_v48, %v563_v35  ;;  %v279_v51 = vmul.f32 %v573_v48, %v565_v37  ;;  %v280_v52 = vmul.f32 %v573_v48, %v567_v38  ;;  %v281_v53 = vmul.f32 %v573_v48, %v569_v41  ;;  %v575_v58 = vpop.eup %574 }
  0x6c   : > { %v577_v59 = vpop.eup %576  ;;  %v254_v60 = vmul.f32 0.6931472, %v575_v58 }
  0x6d   : > { %v288_v54 = vadd.f32 %v278_v50, %v249_v45  ;;  %v289_v55 = vadd.f32 %v279_v51, %v250_v46  ;;  %v290_v56 = vadd.f32 %v280_v52, %v251_v47  ;;  %v291_v57 = vadd.f32 %v281_v53, %v252_v49 }
  0x6e   : > { %v283_v61 = vmul.f32 0.6931472, %v577_v59  ;;  %v255_v1 = vsub.f32 %v875_v14, %v254_v60  ;;  %v256_v5 = vsub.f32 %v877_v15, %v254_v60  ;;  %v257_v10 = vsub.f32 %v879_v16, %v254_v60 }
  0x6f   : > { %578 = vlog2.f32 %v288_v54  ;;  %v258_v20 = vsub.f32 %v881_v17, %v254_v60 }
  0x70   : > { %580 = vlog2.f32 %v289_v55  ;;  %v284_v2 = vsub.f32 %v883_v18, %v283_v61  ;;  %v285_v6 = vsub.f32 %v885_v19, %v283_v61  ;;  %v286_v11 = vsub.f32 %v890_v23, %v283_v61 }
  0x71   : > { %582 = vlog2.f32 %v290_v56  ;;  %v287_v14 = vsub.f32 %v893_v25, %v283_v61  ;;  %v330_v19 = vand.u32 127, %v327_v62 }
  0x72   : > { %584 = vlog2.f32 %v291_v57 }
  0x73   : > { %v335_v41 = vadd.s32 %v334_v29, %v330_v19 }
  0x75   : > { %vm336_vm0 = vcmp.lt.s32.totalorder %v335_v41, 256 }
  0x7c   : > { %v579_v63 = vpop.eup %578 }
  0x7d   : > { %v581_v0 = vpop.eup %580  ;;  %v293_v3 = vmul.f32 0.6931472, %v579_v63 }
  0x7e   : > { %v583_v4 = vpop.eup %582  ;;  %v295_v7 = vmul.f32 0.6931472, %v581_v0 }
  0x7f   : > { %v585_v9 = vpop.eup %584  ;;  %v297_v12 = vmul.f32 0.6931472, %v583_v4  ;;  %v475_v13 = vadd.f32 -0.6931472, %v293_v3 }
  0x80   : > { %v299_v18 = vmul.f32 0.6931472, %v585_v9  ;;  %v476_v21 = vadd.f32 -0.6931472, %v295_v7 }
  0x81   : > { %v477_v22 = vadd.f32 -0.6931472, %v297_v12  ;;  %v304_v15 = vsub.f32 %v284_v2, %v475_v13  ;;  %v312_v24 = vsub.f32 %v255_v1, %v475_v13 }
  0x82   : > { %v478_v26 = vadd.f32 -0.6931472, %v299_v18  ;;  %v305_v27 = vsub.f32 %v285_v6, %v476_v21  ;;  %v313_v28 = vsub.f32 %v256_v5, %v476_v21 }
  0x83   : > { %v306_v16 = vsub.f32 %v286_v11, %v477_v22  ;;  %v308_v30 = vmul.f32 %v304_v15, %v278_v50  ;;  %v314_v23 = vsub.f32 %v257_v10, %v477_v22  ;;  %v316_v31 = vmul.f32 %v312_v24, %v249_v45 }
  0x84   : > { %v307_v32 = vsub.f32 %v287_v14, %v478_v26  ;;  %v309_v17 = vmul.f32 %v305_v27, %v279_v51  ;;  %v315_v33 = vsub.f32 %v258_v20, %v478_v26  ;;  %v317_v25 = vmul.f32 %v313_v28, %v250_v46 }
  0x85   : > { %v310_v34 = vmul.f32 %v306_v16, %v280_v52  ;;  %v318_v35 = vmul.f32 %v314_v23, %v251_v47  ;;  %v320_v36 = vadd.f32 %v316_v31, %v308_v30 }
  0x86   : > { %v311_v37 = vmul.f32 %v307_v32, %v281_v53  ;;  %v319_v38 = vmul.f32 %v315_v33, %v252_v49  ;;  %v321_v39 = vadd.f32 %v317_v25, %v309_v17 }
  0x87   : > { %v322_v40 = vadd.f32 %v318_v35, %v310_v34 }
  0x88   : > { %v323_v42 = vadd.f32 %v319_v38, %v311_v37  ;;  %v324_v43 = vadd.f32 %v321_v39, %v320_v36 }
  0x8a   : > { %v325_v44 = vadd.f32 %v324_v43, %v322_v40 }
  0x8c   : > { %v326_v45 = vadd.f32 %v325_v44, %v323_v42 }
  0x8e   : > { %v337_v46 = vsel %vm336_vm0, %v326_v45, 0.0 }
  0x8f   : > { %339 = vst [vmem:[%s221_s19] sm:$0xff] %v337_v46 }
  0x90   : > { %655 = shalt.err (!%p652_p7)
}
  0x91   : > { %s656_s27 = scalar_lea.hbm %s353_s8, 128  ;;  %s660_s6 = scalar_lea.hbm %s956_s2, 256 }
  0x92   : > { %p657_p10 = scmp.ne.s32.totalorder %s353_s8, %s656_s27  ;;  %p661_p3 = scmp.lt.s32.totalorder %s353_s8, %s956_s2 }
  0x93   : > { %p662_p8 = scmp.lt.s32.totalorder %s660_s6, %s656_s27 }
  0x94   : > { %p658_p1 = pnand %p657_p10, %p799_p9 }
  0x95   : > { %p663_p0 = por %p662_p8, %p661_p3 }
  0x96   : > { %p659_p13 = pneg %p658_p1 }
  0x98   : > { %p664_p12 = pnand %p663_p0, %p659_p13 }
  0x9a   : > { %667 = shalt.err (!%p664_p12)
}
  0x9b   : > { %489 = dma.vmem_to_hbm [thread:$0]  (%p799_p9), %s909_s28, 128, %s353_s8, %s341_s15  }
  0x9c PF: > { %s367_s18 = sand.u32 1, %s706_s9   ;;  %p963_p2 = scmp.ge.s32.totalorder %s726_s14, 2 }
  0x9d   : > { %s368_s21 = scalar_lea.sflag [#allocation4], %s367_s18 }
  0x9e   : > { %p499_p5 = pnand %p963_p2, %p806_p11 }
  0xa0   : > { %p500_p6 = pneg %p499_p5 }
  0xa2   : > { %701 = dma.done.wait (%p500_p6), %s368_s21, 128  }
  0xa3   : > { %703 = vsyncadd (%p500_p6), %s368_s21, 4294967168  ;;  %s21_s14 = sadd.s32 1, %s726_s14   ;;  %s964_s9 = smov %s710_s10 }
  0xa4   : > { %p18_p4 = scmp.ge.s32.totalorder %s21_s14, 4   ;;  %s965_s10 = smov %s714_s11 }
  0xa5   : > { %s966_s11 = smov %s804_s23  ;;  %s967_s12 = smov %s722_s13 }
  0xa6   : > { %s968_s13 = smov %s970_s17  ;;  %20 = sbr.rel (!%p18_p4) target bundleno = 8 (0x8), region = 86 }
  0xab   :  { %373 = vsyncpa [#allocation3], 1 }
  0xac   :  { %375 = vsyncpa [#allocation3 + $0x1], 1 }
  0xad   :  { %376 = vsyncpa [#allocation6], 1 }
  0xae   :  { %378 = vsyncpa [#allocation6 + $0x1], 1 }
  0xaf   :  { %379 = vsyncpa [#allocation4], 1 }
  0xb0   :  { %381 = vsyncpa [#allocation4 + $0x1], 1 }

</bundles_post_ra>
